<compile_context>
chip_gen: v5e
topology: v5e:2x2
jax: 0.10.0
libtpu: 0.0.40
codegen_flags: <defaults>
</compile_context>

<pallas_src>
import math
import numpy as np
import jax
import jax.numpy as jnp
from jax import lax
from jax.experimental import pallas as pl
from jax.experimental.pallas import tpu as pltpu


def _dwt_matrices(H, W, band_low, band_high):
    """Builds matrix_low_0, matrix_low_1, matrix_high_0, matrix_high_1 exactly
    like DWT_2D.get_matrix (numpy, deterministic, no pywt dependency)."""
    band_length = len(band_low)
    assert band_length % 2 == 0
    half = band_length // 2
    L1 = max(H, W)
    L = L1 // 2
    matrix_h = np.zeros((L, L1 + band_length - 2), dtype=np.float64)
    matrix_g = np.zeros((L1 - L, L1 + band_length - 2), dtype=np.float64)
    end = None if half == 1 else -half + 1

    index = 0
    for i in range(L):
        for j in range(band_length):
            matrix_h[i, index + j] = band_low[j]
        index += 2
    matrix_h_0 = matrix_h[0:H // 2, 0:H + band_length - 2]
    matrix_h_1 = matrix_h[0:W // 2, 0:W + band_length - 2]

    index = 0
    for i in range(L1 - L):
        for j in range(band_length):
            if index + j == matrix_g.shape[1]:
                continue
            matrix_g[i, index + j] = band_high[j]
        index += 2
    matrix_g_0 = matrix_g[0:H - H // 2, 0:H + band_length - 2]
    matrix_g_1 = matrix_g[0:W - W // 2, 0:W + band_length - 2]

    matrix_h_0 = matrix_h_0[:, half - 1:end]
    matrix_h_1 = matrix_h_1[:, half - 1:end].T
    matrix_g_0 = matrix_g_0[:, half - 1:end]
    matrix_g_1 = matrix_g_1[:, half - 1:end].T

    return (jnp.asarray(matrix_h_0, jnp.float32),   # matrix_low_0  (H//2, H)
            jnp.asarray(matrix_h_1, jnp.float32),   # matrix_low_1  (W, W//2)
            jnp.asarray(matrix_g_0, jnp.float32),   # matrix_high_0 (H-H//2, H)
            jnp.asarray(matrix_g_1, jnp.float32))   # matrix_high_1 (W, W-W//2)


def _fused_dwt_matrices(H, W, band_low, band_high):
    ml0, ml1, mh0, mh1 = _dwt_matrices(H, W, band_low, band_high)
    m0 = jnp.concatenate([ml0, mh0], axis=0)   # (H, H): rows [0:H//2] = low pass
    m1 = jnp.concatenate([ml1, mh1], axis=1)   # (W, W): cols [0:W//2] = low pass
    return m0, m1


def _dwt2d_fused_kernel(x_ref, m0_ref, m1_ref, y_ref):
    x = x_ref[...]                                   # (TB, H, W)
    tb, h, w = x.shape                               # static block shape
    # Row transform for all TB planes as one batched MXU matmul: [L; H] = M0 @ x
    m0b = jnp.broadcast_to(m0_ref[...][None, :, :], (tb, h, h))
    t = lax.dot_general(m0b, x, (((2,), (1,)), ((0,), (0,))),
                        preferred_element_type=jnp.float32)          # (TB, H, W)
    # Column transform flattened so the MXU M-dim is TB*H:
    #   Y = [L; H] @ [ML1 | MH1]  ->  quadrants are LL | LH / HL | HH
    y = jnp.dot(t.reshape(tb * h, w), m1_ref[...],
                preferred_element_type=jnp.float32)                  # (TB*H, W)
    y_ref[...] = y.reshape(tb, h, w).astype(y_ref.dtype)


def _choose_tb(B, H, W, budget_bytes=28 << 20):
    """Planes per grid step, sized against a VMEM budget that is safe on
    v5e/v6e (128 MiB) and v7x (64 MiB)."""
    plane = 4 * H * W                      # one f32 plane
    # ~6 live (TB,H,W) f32 copies (2x in, 2x out, ~2x temps) + TB*(H,H) temp
    per_tb = 6 * plane + 4 * H * H
    const = 4 * 2 * (H * H + W * W)        # double-buffered fused filters
    cap = max(1, (budget_bytes - const) // per_tb)
    tb = int(min(cap, B))
    if B > 1:
        # keep at least 2 grid steps so both v7x TensorCores get work
        tb = min(tb, (B + 1) // 2)
    return max(tb, 1)


def dwt_2d(x):
    """DWT_2D('haar') forward. x: (N, C, H, W) float32 -> (LL, LH, HL, HH)."""
    # pywt 'haar' reconstruction filters (deterministic, no pywt dependency).
    s = 1.0 / math.sqrt(2.0)
    band_low = [s, s]
    band_high = [s, -s]

    N, C, H, W = x.shape
    H2, W2 = H // 2, W // 2
    Hh, Wh = H - H2, W - W2
    m0, m1 = _fused_dwt_matrices(H, W, band_low, band_high)

    B = N * C
    xb = x.reshape(B, H, W)

    TB = _choose_tb(B, H, W)
    G = pl.cdiv(B, TB)
    Bp = G * TB
    if Bp != B:
        xb = jnp.pad(xb, ((0, Bp - B), (0, 0), (0, 0)))

    y = pl.pallas_call(
        _dwt2d_fused_kernel,
        out_shape=jax.ShapeDtypeStruct((Bp, H, W), x.dtype),
        grid_spec=pltpu.PrefetchScalarGridSpec(
            num_scalar_prefetch=0,
            grid=(G,),
            in_specs=[
                pl.BlockSpec((TB, H, W), lambda b: (b, 0, 0)),   # x planes
                pl.BlockSpec((H, H), lambda b: (0, 0)),          # fused M0
                pl.BlockSpec((W, W), lambda b: (0, 0)),          # fused M1
            ],
            out_specs=pl.BlockSpec((TB, H, W), lambda b: (b, 0, 0)),
        ),
        compiler_params=pltpu.CompilerParams(
            dimension_semantics=("parallel",),
            vmem_limit_bytes=48 << 20,
        ),
        cost_estimate=pl.CostEstimate(
            flops=int(2 * Bp * H * W * (H + W)),
            transcendentals=0,
            bytes_accessed=int(2 * Bp * H * W * 4 + 4 * (H * H + W * W)),
        ),
    )(xb, m0, m1)

    y = y[:B]
    ll = y[:, :H2, :W2].reshape(N, C, H2, W2)
    lh = y[:, :H2, W2:].reshape(N, C, H2, Wh)
    hl = y[:, H2:, :W2].reshape(N, C, Hh, W2)
    hh = y[:, H2:, W2:].reshape(N, C, Hh, Wh)
    return ll, lh, hl, hh


if __name__ == "__main__":
    N, C, H, W = 2, 4, 16, 16
    key = jax.random.PRNGKey(0)
    x = jax.random.normal(key, (N, C, H, W), dtype=jnp.float32)

    outs = dwt_2d(x)
    outs = jax.block_until_ready(outs)

    # Pure-JAX reference (same math as DWTFunction_2D.forward) for sanity.
    s = 1.0 / math.sqrt(2.0)
    ml0, ml1, mh0, mh1 = _dwt_matrices(H, W, [s, s], [s, -s])
    Lr = jnp.einsum('ph,nchw->ncpw', ml0, x)
    Hr = jnp.einsum('ph,nchw->ncpw', mh0, x)
    refs = (jnp.einsum('ncpw,wq->ncpq', Lr, ml1),
            jnp.einsum('ncpw,wq->ncpq', Lr, mh1),
            jnp.einsum('ncpw,wq->ncpq', Hr, ml1),
            jnp.einsum('ncpw,wq->ncpq', Hr, mh1))
    exp_shapes = ((N, C, H // 2, W // 2), (N, C, H // 2, W - W // 2),
                  (N, C, H - H // 2, W // 2), (N, C, H - H // 2, W - W // 2))
    for o, r, es in zip(outs, refs, exp_shapes):
        assert o.shape == es
        np.testing.assert_allclose(np.asarray(o), np.asarray(r),
                                   rtol=1e-5, atol=1e-5)

    print("KERNEL_OK")
</pallas_src>

<mosaic_0001>
module attributes {stable_mosaic.version = 11 : i64} {
  func.func @_dwt2d_fused_kernel(%arg0: i32, %arg1: memref<4x16x16xf32, #tpu.memory_space<vmem>>, %arg2: memref<16x16xf32, #tpu.memory_space<vmem>>, %arg3: memref<16x16xf32, #tpu.memory_space<vmem>>, %arg4: memref<4x16x16xf32, #tpu.memory_space<vmem>>) attributes {dimension_semantics = [#tpu.dimension_semantics<parallel>], iteration_bounds = array<i64: 2>, scalar_prefetch = 0 : i64, scratch_operands = 0 : i64, tpu.core_type = #tpu.core_type<tc>, window_params = [{transform_indices = @transform_0, window_bounds = array<i64: 4, 16, 16>}, {pipeline_mode = #tpu.pipeline_mode<synchronous>, transform_indices = @transform_1, window_bounds = array<i64: 16, 16>}, {pipeline_mode = #tpu.pipeline_mode<synchronous>, transform_indices = @transform_2, window_bounds = array<i64: 16, 16>}, {transform_indices = @transform_3, window_bounds = array<i64: 4, 16, 16>}]} {
    %c0 = arith.constant 0 : index
    %c0_0 = arith.constant 0 : index
    %c0_1 = arith.constant 0 : index
    %0 = vector.load %arg1[%c0, %c0_0, %c0_1] : memref<4x16x16xf32, #tpu.memory_space<vmem>>, vector<4x16x16xf32>
    %c0_2 = arith.constant 0 : index
    %c0_3 = arith.constant 0 : index
    %1 = vector.load %arg2[%c0_2, %c0_3] : memref<16x16xf32, #tpu.memory_space<vmem>>, vector<16x16xf32>
    %2 = vector.shape_cast %1 : vector<16x16xf32> to vector<1x16x16xf32>
    %3 = vector.shape_cast %2 : vector<1x16x16xf32> to vector<1x16x16xf32>
    %4 = vector.broadcast %3 : vector<1x16x16xf32> to vector<4x16x16xf32>
    %cst = arith.constant dense<0.000000e+00> : vector<4x16x16xf32>
    %5 = tpu.matmul %4, %0, %cst {dimension_numbers = #tpu.dot_dimension_numbers<[2], [1], [1], [2], [0, 0, 0, 1, 1, 2], [0], [0]>} : vector<4x16x16xf32>, vector<4x16x16xf32>, vector<4x16x16xf32> -> vector<4x16x16xf32>
    %6 = vector.shape_cast %5 : vector<4x16x16xf32> to vector<64x16xf32>
    %c0_4 = arith.constant 0 : index
    %c0_5 = arith.constant 0 : index
    %7 = vector.load %arg3[%c0_4, %c0_5] : memref<16x16xf32, #tpu.memory_space<vmem>>, vector<16x16xf32>
    %cst_6 = arith.constant dense<0.000000e+00> : vector<64x16xf32>
    %8 = tpu.matmul %6, %7, %cst_6 {dimension_numbers = #tpu.dot_dimension_numbers<[1], [0], [0], [1], [0, 0, 1, 1], [], []>} : vector<64x16xf32>, vector<16x16xf32>, vector<64x16xf32> -> vector<64x16xf32>
    %9 = vector.shape_cast %8 : vector<64x16xf32> to vector<4x16x16xf32>
    %c0_7 = arith.constant 0 : index
    %c0_8 = arith.constant 0 : index
    %c0_9 = arith.constant 0 : index
    %10 = vector.load %arg4[%c0_7, %c0_8, %c0_9] : memref<4x16x16xf32, #tpu.memory_space<vmem>>, vector<4x16x16xf32>
    tpu.vector_store %arg4[%c0_7, %c0_8, %c0_9], %9 {strides = array<i32>} : memref<4x16x16xf32, #tpu.memory_space<vmem>>, vector<4x16x16xf32>,
    return
  }
  func.func @transform_0(%arg0: i32) -> (i32, i32, i32) {
    %c0_i32 = arith.constant 0 : i32
    %c0_i32_0 = arith.constant 0 : i32
    %c0_i32_1 = arith.constant 0 : i32
    return %arg0, %c0_i32, %c0_i32_0 : i32, i32, i32
  }
  func.func @transform_1(%arg0: i32) -> (i32, i32) {
    %c0_i32 = arith.constant 0 : i32
    %c0_i32_0 = arith.constant 0 : i32
    %c0_i32_1 = arith.constant 0 : i32
    return %c0_i32, %c0_i32_0 : i32, i32
  }
  func.func @transform_2(%arg0: i32) -> (i32, i32) {
    %c0_i32 = arith.constant 0 : i32
    %c0_i32_0 = arith.constant 0 : i32
    %c0_i32_1 = arith.constant 0 : i32
    return %c0_i32, %c0_i32_0 : i32, i32
  }
  func.func @transform_3(%arg0: i32) -> (i32, i32, i32) {
    %c0_i32 = arith.constant 0 : i32
    %c0_i32_0 = arith.constant 0 : i32
    %c0_i32_1 = arith.constant 0 : i32
    return %arg0, %c0_i32, %c0_i32_0 : i32, i32, i32
  }
}

</mosaic_0001>

<bundles_post_ra>
// kernel: tpu_custom_call.1
= control target key start
LH: loop header
LB: loop body
LE: loop exit
PB: predicated region body
PF: predicated region fallthrough
CT: control target
= control target key end

     0   :  { %8 = vsyncpa [#allocation3], 0  ;;  %s999_s0 = inlined_call_operand.hbm [shape: f32[8,16,16], index: 0, kind: input, shape index: {}]   ;;  %s1000_s1 = inlined_call_operand.hbm [shape: f32[16,16], index: 1, kind: input, shape index: {}]   ;;  %s1001_s2 = inlined_call_operand.hbm [shape: f32[16,16], index: 2, kind: input, shape index: {}]   ;;  %s1002_s3 = inlined_call_operand.hbm [shape: f32[8,16,16], index: 3, kind: output, shape index: {}]  }
   0x1   :  { %10 = vsyncpa [#allocation3 + $0x1], 0 }
   0x2   :  { %11 = vsyncpa [#allocation6], 0 }
   0x3   :  { %12 = vsyncpa [#allocation4], 0 }
   0x4   :  { %14 = vsyncpa [#allocation4 + $0x1], 0  ;;  %s821_s12 = smov 0   ;;  %s823_s13 = smov 0  }
   0x5   :  { %s825_s14 = smov 0   ;;  %s827_s15 = smov 0  }
   0x6 LB: > { %s842_s16 = sadd.s32 4294967295, %s793_s15   ;;  %s520_s17 = sadd.s32 4294967294, %s793_s15   ;;  %s793_s15 = sphi %s827_s15, %s1012_s15   ;;  %s789_s14 = sphi %s825_s14, %s1011_s14   ;;  %s785_s13 = sphi %s823_s13, %s1010_s13   ;;  %s781_s12 = sphi %s821_s12, %s1009_s12  }
   0x7   : > { %p40_p0 = scmp.ne.s32.totalorder %s785_s13, %s781_s12  ;;  %p41_p1 = scmp.eq.s32.totalorder %s842_s16, 0 }
   0x8   : > { %p106_p2 = scmp.eq.s32.totalorder %s842_s16, 1  ;;  %p112_p3 = scmp.eq.s32.totalorder %s520_s17, 1 }
   0x9   : > { %p851_p4 = por %p41_p1, %p40_p0  ;;  %p521_p5 = scmp.ge.s32.totalorder %s793_s15, 1 }
   0xa   : > { %p856_p6 = por %p112_p3, %p40_p0  ;;  %p119_p7 = scmp.lt.s32.totalorder %s793_s15, 3 }
   0xb   : > { %s130_s22 = sshll.u32 %s1000_s1, 4  ;;  %s795_s24 = smov [#allocation5]   ;;  %s131_s22 = int_to_ptr.hbm [resolvable:$true] %s130_s22 }
   0xc   : > { %p864_p8 = pnand %p521_p5, %p119_p7  ;;  %s132_s25 = sshll.u32 %s795_s24, 4  ;;  %s133_s25 = int_to_ptr.vmem [resolvable:$true] %s132_s25 }
   0xd   : > { %s144_s28 = sshll.u32 %s1001_s2, 4  ;;  %s796_s29 = smov 128   ;;  %s145_s28 = int_to_ptr.hbm [resolvable:$true] %s144_s28 }
   0xe   : > { %p574_p9 = pneg %p864_p8  ;;  %s797_s30 = smov 8  }
   0xf   : > { %s798_s4 = smov [#allocation7]   ;;  %s883_s6 = sadd.s32 1, %s793_s15  }
  0x10   : > { %p575_p10 = pnand %p574_p9, %p41_p1  ;;  %s146_s5 = sshll.u32 %s798_s4, 4  ;;  %s147_s5 = int_to_ptr.vmem [resolvable:$true] %s146_s5 }
  0x11   : > { %s27_s7 = sadd.s32 1, %s789_s14  ;;  %s24_s8 = ssub.s32 %s793_s15, %s883_s6 }
  0x12   : > { %577 = dma.hbm_to_vmem [thread:$0]  (!%p575_p10), %s131_s22, 256, %s133_s25, [#allocation6], %s796_s29, %s796_s29, %s797_s30  }
  0x13   : > { %580 = dma.hbm_to_vmem [thread:$0]  (!%p575_p10), %s145_s28, 256, %s147_s5, [#allocation6], %s796_s29, %s796_s29, %s797_s30  }
  0x14   : > { %p34_p12 = scmp.ne.s32.totalorder %s789_s14, %s785_s13  ;;  %p25_p13 = scmp.eq.s32.totalorder %s24_s8, 0 }
  0x15   : > { %p35_p0 = scmp.eq.s32.totalorder %s793_s15, 0  ;;  %p591_p5 = scmp.lt.s32.totalorder %s793_s15, 2 }
  0x16   : > { %p893_p3 = por %p106_p2, %p34_p12  ;;  %s160_s11 = sand.u32 1, %s789_s14  }
  0x17   : > { %s899_s10 = scalar_select %p25_p13, %s789_s14, %s27_s7  }
  0x18   : > { %p36_p7 = por %p35_p0, %p34_p12  ;;  %s525_s17 = sshll.u32 %s160_s11, 6 }
  0x19   : > { %s557_s20 = sshll.u32 %s793_s15, 6  ;;  %s164_s25 = scalar_lea.vmem [#allocation2], %s525_s17 }
  0x1a   : > { %s170_s24 = scalar_lea.hbm %s999_s0, %s557_s20  ;;  %s173_s26 = sshll.u32 %s164_s25, 4  ;;  %s174_s26 = int_to_ptr.vmem [resolvable:$true] %s173_s26 }
  0x1b   : > { %s171_s27 = sshll.u32 %s170_s24, 4  ;;  %p906_p2 = pnand %p591_p5, %p36_p7  ;;  %s172_s27 = int_to_ptr.hbm [resolvable:$true] %s171_s27 }
  0x1c   : > { %s161_s4 = scalar_lea.sflag [#allocation3], %s160_s11  ;;  %s693_s5 = sshra.s32 %s172_s27, 4  ;;  %s694_s5 = int_to_ptr.hbm [resolvable:$true] %s693_s5 }
  0x1d   : > { %s695_s7 = scalar_lea.hbm %s694_s5, 64  ;;  %p697_p10 = pneg %p906_p2 }
  0x1e   : > { %p696_p9 = scmp.ne.s32.totalorder %s694_s5, %s695_s7  ;;  %s700_s20 = scalar_lea.hbm %s999_s0, 128 }
  0x1f   : > { %p701_p0 = scmp.lt.s32.totalorder %s694_s5, %s999_s0  ;;  %p702_p5 = scmp.lt.s32.totalorder %s700_s20, %s695_s7 }
  0x20   : > { %p698_p12 = pnand %p697_p10, %p696_p9 }
  0x21   : > { %p703_p7 = por %p702_p5, %p701_p0 }
  0x22   : > { %p699_p13 = pneg %p698_p12 }
  0x24   : > { %p704_p11 = pnand %p703_p7, %p699_p13 }
  0x26   : > { %707 = shalt.err (!%p704_p11)
}
  0x27   : > { %584 = dma.hbm_to_vmem [thread:$0]  (!%p906_p2), %s172_s27, 1024, %s174_s26, %s161_s4, %s796_s29, %s796_s29, %s797_s30  }
  0x28   : > { %185 = sbr.rel (%p864_p8) target bundleno = 344 (0x158), region = 32  ;;  %s926_s11 = sand.u32 (!%p864_p8), 1, %s785_s13  }
  0x29   : > { %s530_s24 = sshll.u32 (!%p864_p8), %s926_s11, 6  ;;  %s188_s25 = scalar_lea.sflag (!%p864_p8), [#allocation3], %s926_s11 }
  0x2a   : > { %s191_s5 = scalar_lea.vmem (!%p864_p8), [#allocation2], %s530_s24 }
  0x2d   : > { %768 = dma.done.wait (%p851_p4), %s188_s25, 1024  }
  0x2e   : > { %770 = vsyncadd (%p851_p4), %s188_s25, 4294966272 }
  0x2f   : > { %772 = dma.done.wait (%p41_p1), [#allocation6], 512  }
  0x30   : > { %774 = vsyncadd (%p41_p1), [#allocation6], 4294966784  ;;  %v232_v0 = vld [vmem:[%s191_s5 + $0x28] sm:$0xff]  ;;  %v231_v1 = vld [vmem:[%s191_s5 + $0x20] sm:$0xff]  ;;  %vm237_vm0 = vcmask 130048   ;;  %s224_s18 = scalar_lea.vmem [#allocation8], %s530_s24 }
  0x31   : > { %304 = vmatpush.msra.mxu3 %v232_v0  ;;  %v235_v2 = vld [vmem:[#allocation5] sm:$0xff]  ;;  %v234_v3 = vld [vmem:[%s191_s5 + $0x38] sm:$0xff]  ;;  %v228_v4 = vld [vmem:[%s191_s5 + $0x8] sm:$0xff]  ;;  %s559_s23 = sshll.u32 %s842_s16, 6  ;;  %s425_s27 = sshll.u32 %s224_s18, 4  ;;  %s426_s27 = int_to_ptr.vmem [resolvable:$true] %s425_s27 }
  0x32   : > { %v227_v5 = vld [vmem:[%s191_s5] sm:$0xff]  ;;  %258 = vmatpush.msra.mxu1 %v228_v4  ;;  %v337_v6 = vld [vmem:[#allocation7 + $0x8] sm:$0xff]  ;;  %v233_v7 = vld [vmem:[%s191_s5 + $0x30] sm:$0xff]  ;;  %s424_s26 = scalar_lea.hbm %s1002_s3, %s559_s23  ;;  %s412_s4 = scalar_lea.sflag [#allocation4], %s926_s11 }
  0x33   : > { %305 = vmatpush.msra.mxu3 %v231_v1  ;;  %v230_v8 = vld [vmem:[%s191_s5 + $0x18] sm:$0xff]  ;;  %560 = vmatpush.msra.mxu2 %v337_v6  ;;  %v229_v9 = vld [vmem:[%s191_s5 + $0x10] sm:$0xff]  ;;  %v236_v10 = vld [vmem:[#allocation5 + $0x8] sm:$0xff]  ;;  %s427_s28 = sshll.u32 %s424_s26, 4  ;;  %s743_s20 = scalar_lea.hbm %s1002_s3, 128  ;;  %s428_s28 = int_to_ptr.hbm [resolvable:$true] %s427_s28 }
  0x34   : > { %538 = vmatmul.msk.f32.vlgmr.msra.gmra.mxu3 %vm237_vm0, %v235_v2  ;;  %259 = vmatpush.msra.mxu1 %v227_v5  ;;  %v336_v11 = vld [vmem:[#allocation7] sm:$0xff]  ;;  %s737_s16 = sshra.s32 %s428_s28, 4  ;;  %s738_s16 = int_to_ptr.hbm [resolvable:$true] %s737_s16 }
  0x35   : > { %327 = vmatpush.msrb.mxu3 %v234_v3  ;;  %534 = vmatmul.msk.f32.vlgmr.msra.gmra.mxu1 %vm237_vm0, %v235_v2  ;;  %s739_s7 = scalar_lea.hbm %s738_s16, 64  ;;  %p744_p11 = scmp.lt.s32.totalorder %s738_s16, %s1002_s3 }
  0x36   : > { %376 = vmatpush.msra.mxu0 %v337_v6  ;;  %281 = vmatpush.msrb.mxu1 %v230_v8  ;;  %p740_p1 = scmp.ne.s32.totalorder %s738_s16, %s739_s7  ;;  %p745_p2 = scmp.lt.s32.totalorder %s743_s20, %s739_s7 }
  0x37   : > { %328 = vmatpush.msrb.mxu3 %v233_v7  ;;  %561 = vmatpush.msra.mxu2 %v336_v11 }
  0x38   : > { %282 = vmatpush.msrb.mxu1 %v229_v9  ;;  %377 = vmatpush.msra.mxu0 %v336_v11  ;;  %p741_p4 = pnand %p740_p1, %p893_p3  ;;  %p746_p9 = por %p745_p2, %p744_p11 }
  0x3a   : > { %p742_p8 = pneg %p741_p4 }
  0x3c   : > { %539 = vmatmul.msk.f32.gmra.mxu3 %vm237_vm0, %v236_v10  ;;  %p747_p10 = pnand %p746_p9, %p742_p8 }
  0x3d   : > { %535 = vmatmul.msk.f32.gmra.mxu1 %vm237_vm0, %v236_v10 }
  0x44   : > { %540 = vmatmul.msk.f32.vlgmr.msrb.gmra.mxu3 %vm237_vm0, %v235_v2 }
  0x45   : > { %536 = vmatmul.msk.f32.vlgmr.msrb.gmra.mxu1 %vm237_vm0, %v235_v2 }
  0x4c   : > { %541 = vmatmul.msk.f32.gmra.mxu3 %vm237_vm0, %v236_v10 }
  0x4d   : > { %537 = vmatmul.msk.f32.gmra.mxu1 %vm237_vm0, %v236_v10 }
  0xb2   : > { %v261_v12 = vpop.f32.mrf.mxu1 }
  0xb3   : > { %542 = vmatmul.msk.f32.vlgmr.msra.gmra.mxu0 %vm237_vm0, %v261_v12 }
  0xb7   : > { %v307_v13 = vpop.f32.mrf.mxu3 }
  0xb8   : > { %546 = vmatmul.msk.f32.vlgmr.msra.gmra.mxu2 %vm237_vm0, %v307_v13 }
  0xba   : > { %v264_v14 = vpop.f32.mrf.mxu1 }
  0xbb   : > { %543 = vmatmul.msk.f32.gmra.mxu0 %vm237_vm0, %v264_v14 }
  0xbf   : > { %v310_v15 = vpop.f32.mrf.mxu3 }
  0xc0   : > { %547 = vmatmul.msk.f32.gmra.mxu2 %vm237_vm0, %v310_v15 }
  0xc2   : > { %v284_v16 = vpop.f32.mrf.mxu1 }
  0xc3   : > { %544 = vmatmul.msk.f32.gmra.mxu0 %vm237_vm0, %v284_v16 }
  0xc7   : > { %v330_v17 = vpop.f32.mrf.mxu3 }
  0xc8   : > { %548 = vmatmul.msk.f32.gmra.mxu2 %vm237_vm0, %v330_v17 }
  0xca   : > { %v287_v18 = vpop.f32.mrf.mxu1 }
  0xcb   : > { %545 = vmatmul.msk.f32.gmra.mxu0 %vm237_vm0, %v287_v18 }
  0xcf   : > { %v333_v19 = vpop.f32.mrf.mxu3 }
  0xd0   : > { %549 = vmatmul.msk.f32.gmra.mxu2 %vm237_vm0, %v333_v19 }
 0x130   : > { %v379_v20 = vpop.f32.mrf.mxu0 }
 0x131   : > { %403 = vst.msk [vmem:[%s224_s18] sm:$0xff] %vm237_vm0, %v379_v20 }
 0x138   : > { %v382_v21 = vpop.f32.mrf.mxu0 }
 0x139   : > { %404 = vst.msk [vmem:[%s224_s18 + $0x8] sm:$0xff] %vm237_vm0, %v382_v21 }
 0x13b   : > { %v391_v22 = vpop.f32.mrf.mxu2 }
 0x13c   : > { %407 = vst.msk [vmem:[%s224_s18 + $0x20] sm:$0xff] %vm237_vm0, %v391_v22 }
 0x140   : > { %v385_v23 = vpop.f32.mrf.mxu0 }
 0x141   : > { %405 = vst.msk [vmem:[%s224_s18 + $0x10] sm:$0xff] %vm237_vm0, %v385_v23 }
 0x143   : > { %v394_v24 = vpop.f32.mrf.mxu2 }
 0x144   : > { %408 = vst.msk [vmem:[%s224_s18 + $0x28] sm:$0xff] %vm237_vm0, %v394_v24 }
 0x148   : > { %v388_v25 = vpop.f32.mrf.mxu0 }
 0x149   : > { %406 = vst.msk [vmem:[%s224_s18 + $0x18] sm:$0xff] %vm237_vm0, %v388_v25 }
 0x14b   : > { %v397_v26 = vpop.f32.mrf.mxu2 }
 0x14c   : > { %409 = vst.msk [vmem:[%s224_s18 + $0x30] sm:$0xff] %vm237_vm0, %v397_v26 }
 0x153   : > { %v400_v27 = vpop.f32.mrf.mxu2 }
 0x154   : > { %410 = vst.msk [vmem:[%s224_s18 + $0x38] sm:$0xff] %vm237_vm0, %v400_v27 }
 0x155   : > { %750 = shalt.err (!%p747_p10)
}
 0x156   : > { %s799_s11 = smov 128   ;;  %s800_s24 = smov 8  }
 0x157   : > { %572 = dma.vmem_to_hbm [thread:$0]  (%p893_p3), %s426_s27, 1024, %s428_s28, %s412_s4, %s799_s11, %s799_s11, %s800_s24  }
 0x158 PF: > { %s442_s25 = sand.u32 1, %s781_s12   ;;  %p1008_p12 = scmp.ge.s32.totalorder %s793_s15, 2 }
 0x159   : > { %s443_s5 = scalar_lea.sflag [#allocation4], %s442_s25 }
 0x15a   : > { %p586_p13 = pnand %p1008_p12, %p856_p6 }
 0x15c   : > { %p587_p0 = pneg %p586_p13 }
 0x15e   : > { %776 = dma.done.wait (%p587_p0), %s443_s5, 1024  }
 0x15f   : > { %778 = vsyncadd (%p587_p0), %s443_s5, 4294966272  ;;  %p17_p5 = scmp.ge.s32.totalorder %s883_s6, 4   ;;  %s1009_s12 = smov %s785_s13 }
 0x160   : > { %s1010_s13 = smov %s789_s14  ;;  %s1011_s14 = smov %s899_s10 }
 0x161   : > { %s1012_s15 = smov %s883_s6  ;;  %19 = sbr.rel (!%p17_p5) target bundleno = 6 (0x6), region = 85 }
 0x166   :  { %449 = vsyncpa [#allocation3], 1 }
 0x167   :  { %451 = vsyncpa [#allocation3 + $0x1], 1 }
 0x168   :  { %452 = vsyncpa [#allocation6], 1 }
 0x169   :  { %453 = vsyncpa [#allocation4], 1 }
 0x16a   :  { %455 = vsyncpa [#allocation4 + $0x1], 1 }

</bundles_post_ra>
